<compile_context>
chip_gen: v7x
topology: tpu7x:2x2x1
jax: 0.10.0
libtpu: 0.0.40
codegen_flags: <defaults>
</compile_context>

<pallas_src>
import numpy as np
import jax
import jax.numpy as jnp
from jax.experimental import pallas as pl
from jax.experimental.pallas import tpu as pltpu

LANE = 128


def round_up(x, m):
    return ((x + m - 1) // m) * m


# ------------------------- VMEM-aware tile selection ------------------------ #

def _vmem_capacity_bytes():
    try:
        return int(pltpu.get_tpu_info().vmem_capacity_bytes)
    except Exception:
        return 64 * 1024 * 1024  # conservative (v7x per-TC) fallback


def _vmem_limit_bytes(capacity):
    # Generation-aware scoped-VMEM limit: use most of the 128 MiB parts (v5e/v6e),
    # leave headroom under v7x's 64 MiB per TensorCore.
    if capacity >= 128 * 1024 * 1024:
        return capacity - 24 * 1024 * 1024
    return max(capacity - 8 * 1024 * 1024, 32 * 1024 * 1024)


def _pick_mlp_row_tile(np_rows, budget, step_bytes, cands=(1024, 512, 256, 128)):
    for need_two in (True, False):
        for rt in cands:
            if np_rows % rt or (need_two and np_rows // rt < 2):
                continue
            if step_bytes(rt) <= budget:
                return rt
    return 128


def _pick_conv_tiles(np_rows, budget, step_bytes,
                     rt_cands=(512, 256, 128),
                     kt_cands=(2048, 1024, 512, 256, 128)):
    # Prefer >=2 row-grid steps (so the "parallel" row axis can split across cores),
    # then the biggest (row_tile, k_tile) whose per-step footprint fits the budget.
    for need_two in (True, False):
        for rt in rt_cands:
            if np_rows % rt or (need_two and np_rows // rt < 2):
                continue
            for kt in kt_cands:
                if np_rows % kt:
                    continue
                if step_bytes(rt, kt) <= budget:
                    return rt, kt
    return 128, 128


# ----------------------------- Pallas kernels ------------------------------ #

def _make_mlp_embed_kernel(n_layers, valid_rows, row_tile):
    """Whole feature_embed MLP (+ trailing H2GCN ReLU) fused in one kernel.

    refs = [w_0, b_0, ..., w_{L-1}, b_{L-1}, o_ref].  Eval-mode BN is already
    folded into the (w, b) pairs on the host; dropout (eval) is the identity.
    Padded node rows (row >= valid_rows) are zeroed so downstream kernels see
    exact zeros in the padding region.
    """
    def kernel(x_ref, *refs):
        o_ref = refs[-1]
        h = x_ref[...].astype(jnp.float32)
        for li in range(n_layers):
            w = refs[2 * li][...]
            b = refs[2 * li + 1][...]
            h = jnp.dot(h, w, preferred_element_type=jnp.float32) + b
            h = jnp.maximum(h, 0.0)   # ReLU (H2GCN applies ReLU after the last layer too)
        row0 = pl.program_id(0) * row_tile
        rid = row0 + jax.lax.broadcasted_iota(jnp.int32, h.shape, 0)
        h = jnp.where(rid < valid_rows, h, 0.0)
        o_ref[...] = h.astype(o_ref.dtype)
    return kernel


def _conv_bn_kernel(a_ref, x_ref, scale_ref, shift_ref, o_ref, acc_ref):
    """K-tiled: o = BN_eval(cat([A @ x, A2 @ x], axis=1)).

    a_ref   : (2, rt, kt) bf16   -- M-stacked [A_tile ; A2_tile], K-slice
    x_ref   : (kt, HP)    bf16   -- K-slice of x0
    o_ref   : (rt, 2*HP)  bf16
    acc_ref : (2*rt, HP)  f32 scratch (persists over the K grid axis)
    """
    k = pl.program_id(1)

    @pl.when(k == 0)
    def _():
        acc_ref[...] = jnp.zeros_like(acc_ref)

    rt = o_ref.shape[0]
    kt = x_ref.shape[0]
    a = a_ref[...].reshape(2 * rt, kt)             # merge leading dim: one MXU matmul
    acc_ref[...] += jnp.dot(a, x_ref[...], preferred_element_type=jnp.float32)

    @pl.when(k == pl.num_programs(1) - 1)
    def _():
        hp = acc_ref.shape[1]
        y1 = acc_ref[:rt, :]
        y2 = acc_ref[rt:, :]
        o_ref[:, :hp] = (y1 * scale_ref[:, :hp] + shift_ref[:, :hp]).astype(o_ref.dtype)
        o_ref[:, hp:] = (y2 * scale_ref[:, hp:] + shift_ref[:, hp:]).astype(o_ref.dtype)


def _conv_jump_project_kernel(a_ref, x1k_ref, x1r_ref, x0r_ref,
                              w0_ref, w1_ref, w2a_ref, w2b_ref, b_ref,
                              o_ref, acc_ref):
    """Fused: last conv (K-tiled) + JumpingKnowledge('cat') + final Linear.

    out = x0 @ W0 + x1 @ W1 + (A @ x1) @ W2a + (A2 @ x1) @ W2b + b
    (W* are row-slices of the final projection weight -> the jump concat is never built.)

    a_ref   : (2, rt, kt)  bf16  -- M-stacked adjacency, K-slice
    x1k_ref : (kt, 2*HP)   bf16  -- K-slice of x1 (contraction operand)
    x1r_ref : (rt, 2*HP)   bf16  -- row tile of x1 (for the W1 term)
    x0r_ref : (rt, HP)     bf16  -- row tile of x0 (for the W0 term)
    acc_ref : (2*rt, 2*HP) f32 scratch = stacked [A@x1 ; A2@x1] row tile
    """
    f32 = jnp.float32
    k = pl.program_id(1)

    @pl.when(k == 0)
    def _():
        acc_ref[...] = jnp.zeros_like(acc_ref)

    rt = o_ref.shape[0]
    kt = x1k_ref.shape[0]
    a = a_ref[...].reshape(2 * rt, kt)
    acc_ref[...] += jnp.dot(a, x1k_ref[...], preferred_element_type=f32)

    @pl.when(k == pl.num_programs(1) - 1)
    def _():
        bf16 = w2a_ref.dtype
        x2a = acc_ref[:rt, :].astype(bf16)
        x2b = acc_ref[rt:, :].astype(bf16)
        out = jnp.dot(x0r_ref[...], w0_ref[...], preferred_element_type=f32)
        out = out + jnp.dot(x1r_ref[...], w1_ref[...], preferred_element_type=f32)
        out = out + jnp.dot(x2a, w2a_ref[...], preferred_element_type=f32)
        out = out + jnp.dot(x2b, w2b_ref[...], preferred_element_type=f32)
        o_ref[...] = (out + b_ref[...]).astype(o_ref.dtype)


# ------------------------------ host wrappers ------------------------------ #

def mlp_embed(x, ws, bs, valid_rows, *, rt, vmem_limit):
    np_rows, fin = x.shape
    hout = ws[-1].shape[1]
    in_specs = [pl.BlockSpec((rt, fin), lambda i: (i, 0))]
    args = [x]
    for w, b in zip(ws, bs):
        in_specs.append(pl.BlockSpec(w.shape, lambda i: (0, 0)))   # weights VMEM-resident
        in_specs.append(pl.BlockSpec(b.shape, lambda i: (0, 0)))
        args.extend([w, b])
    return pl.pallas_call(
        _make_mlp_embed_kernel(len(ws), valid_rows, rt),
        out_shape=jax.ShapeDtypeStruct((np_rows, hout), jnp.bfloat16),
        grid=(np_rows // rt,),
        in_specs=in_specs,
        out_specs=pl.BlockSpec((rt, hout), lambda i: (i, 0)),
        compiler_params=pltpu.CompilerParams(
            dimension_semantics=("parallel",), vmem_limit_bytes=vmem_limit),
    )(*args)


def conv_bn(a_st, x0, scale, shift, *, rt, kt, vmem_limit):
    _, np_rows, _ = a_st.shape
    hp = x0.shape[1]
    return pl.pallas_call(
        _conv_bn_kernel,
        out_shape=jax.ShapeDtypeStruct((np_rows, 2 * hp), x0.dtype),
        grid=(np_rows // rt, np_rows // kt),
        in_specs=[
            pl.BlockSpec((2, rt, kt), lambda i, k: (0, i, k)),   # stacked [A;A2] tile
            pl.BlockSpec((kt, hp), lambda i, k: (k, 0)),         # x0 K-slice
            pl.BlockSpec((1, 2 * hp), lambda i, k: (0, 0)),      # BN scale
            pl.BlockSpec((1, 2 * hp), lambda i, k: (0, 0)),      # BN shift
        ],
        out_specs=pl.BlockSpec((rt, 2 * hp), lambda i, k: (i, 0)),
        scratch_shapes=[pltpu.VMEM((2 * rt, hp), jnp.float32)],
        compiler_params=pltpu.CompilerParams(
            dimension_semantics=("parallel", "arbitrary"),
            vmem_limit_bytes=vmem_limit),
    )(a_st, x0, scale, shift)


def conv_jump_project(a_st, x1, x0, w0, w1, w2a, w2b, b, *, rt, kt, vmem_limit):
    _, np_rows, _ = a_st.shape
    d1 = x1.shape[1]
    d0 = x0.shape[1]
    cp = w0.shape[1]
    return pl.pallas_call(
        _conv_jump_project_kernel,
        out_shape=jax.ShapeDtypeStruct((np_rows, cp), jnp.float32),
        grid=(np_rows // rt, np_rows // kt),
        in_specs=[
            pl.BlockSpec((2, rt, kt), lambda i, k: (0, i, k)),   # stacked [A;A2] tile
            pl.BlockSpec((kt, d1), lambda i, k: (k, 0)),         # x1 K-slice
            pl.BlockSpec((rt, d1), lambda i, k: (i, 0)),         # x1 row tile
            pl.BlockSpec((rt, d0), lambda i, k: (i, 0)),         # x0 row tile
            pl.BlockSpec((d0, cp), lambda i, k: (0, 0)),         # Wf[0:H]
            pl.BlockSpec((d1, cp), lambda i, k: (0, 0)),         # Wf[H:3H]
            pl.BlockSpec((d1, cp), lambda i, k: (0, 0)),         # Wf[3H:5H]
            pl.BlockSpec((d1, cp), lambda i, k: (0, 0)),         # Wf[5H:7H]
            pl.BlockSpec((1, cp), lambda i, k: (0, 0)),          # bias
        ],
        out_specs=pl.BlockSpec((rt, cp), lambda i, k: (i, 0)),
        scratch_shapes=[pltpu.VMEM((2 * rt, d1), jnp.float32)],
        compiler_params=pltpu.CompilerParams(
            dimension_semantics=("parallel", "arbitrary"),
            vmem_limit_bytes=vmem_limit),
    )(a_st, x1, x1, x0, w0, w1, w2a, w2b, b)


# ------------------------- parameters & preprocessing ----------------------- #

def build_normalized_adjs(edge_index, n):
    """Dense equivalent of H2GCN.init_adj (gcn_norm, no self-loops)."""
    row, col = np.asarray(edge_index)
    a = np.zeros((n, n), np.float32)
    a[col, row] = 1.0                      # SparseTensor(row=col, col=row)
    np.fill_diagonal(a, 0.0)               # remove_diag
    a2 = a @ a                             # two-hop counts
    np.fill_diagonal(a2, 0.0)
    a2 = a2 - a
    a2 = (a2 > 0).astype(np.float32)

    def gcn_norm(m):
        deg = m.sum(axis=1)
        dinv = np.where(deg > 0, 1.0 / np.sqrt(np.maximum(deg, 1e-12)), 0.0)
        return (dinv[:, None] * m * dinv[None, :]).astype(np.float32)

    return gcn_norm(a), gcn_norm(a2)


def preprocess_graph(edge_index, num_nodes):
    """One-time graph preprocessing: padded, M-stacked, bf16 adjacency.

    Done once (numpy) so the per-forward wrapper never rebuilds/pads the O(N^2)
    arrays; the HBM copies are already bf16 (half the DMA bytes).
    """
    adj, adj2 = build_normalized_adjs(edge_index, num_nodes)
    np_rows = round_up(num_nodes, LANE)
    a_st = np.zeros((2, np_rows, np_rows), np.float32)
    a_st[0, :num_nodes, :num_nodes] = adj
    a_st[1, :num_nodes, :num_nodes] = adj2
    return dict(N=num_nodes, NP=np_rows,
                a_st=jnp.asarray(a_st, jnp.bfloat16),
                adj=jnp.asarray(adj), adj2=jnp.asarray(adj2))


def init_h2gcn_params(key, in_channels, hidden_channels, out_channels,
                      num_mlp_layers=1, num_layers=2, eps=1e-5):
    assert num_layers == 2, "fused final kernel implemented for num_layers=2 (default)"
    H = hidden_channels
    if num_mlp_layers == 1:
        dims = [(in_channels, H)]
    else:
        dims = [(in_channels, H)] + [(H, H)] * (num_mlp_layers - 1)

    mlp_w, mlp_b, bn_s, bn_t = [], [], [], []
    for li, (fin, fout) in enumerate(dims):
        key, kw, kb = jax.random.split(key, 3)
        bound = 1.0 / float(np.sqrt(fin))
        mlp_w.append(jax.random.uniform(kw, (fin, fout), jnp.float32, -bound, bound))
        mlp_b.append(jax.random.uniform(kb, (fout,), jnp.float32, -bound, bound))
        if li < len(dims) - 1:
            s = jnp.ones((fout,), jnp.float32) / jnp.sqrt(jnp.ones((fout,)) + eps)
            bn_s.append(s)
            bn_t.append(jnp.zeros((fout,), jnp.float32))  # beta - mean*scale

    # H2GCN bns[0] : BatchNorm1d(2H) with default running stats (eval mode)
    s0 = jnp.ones((2 * H,), jnp.float32) / jnp.sqrt(jnp.ones((2 * H,)) + eps)
    t0 = jnp.zeros((2 * H,), jnp.float32)

    last_dim = H * (2 ** (num_layers + 1) - 1)   # 7H for num_layers=2
    key, kw, kb = jax.random.split(key, 3)
    bound = 1.0 / float(np.sqrt(last_dim))
    wf = jax.random.uniform(kw, (last_dim, out_channels), jnp.float32, -bound, bound)
    bf = jax.random.uniform(kb, (out_channels,), jnp.float32, -bound, bound)

    return dict(mlp_w=mlp_w, mlp_b=mlp_b, mlp_bn_scale=bn_s, mlp_bn_shift=bn_t,
                bn0_scale=s0, bn0_shift=t0, wf=wf, bf=bf)


def _fold_mlp_bn(params):
    """Fold eval-mode BN after layer i into layer i+1's weights/bias (exact)."""
    ws = [params['mlp_w'][0]]
    bs = [params['mlp_b'][0]]
    for i in range(1, len(params['mlp_w'])):
        s = params['mlp_bn_scale'][i - 1]
        t = params['mlp_bn_shift'][i - 1]
        w = params['mlp_w'][i]
        b = params['mlp_b'][i]
        ws.append(s[:, None] * w)
        bs.append(b + t @ w)
    return ws, bs


def _pad2(a, r, c):
    a = jnp.asarray(a, jnp.float32)
    out = jnp.zeros((r, c), jnp.float32)
    return out.at[:a.shape[0], :a.shape[1]].set(a)


def _pad_feat_two_block(v, H, HP):
    """(2H,) per-feature vector -> (1, 2*HP) matching the padded concat layout."""
    out = jnp.zeros((1, 2 * HP), jnp.float32)
    out = out.at[0, :H].set(v[:H])
    out = out.at[0, HP:HP + H].set(v[H:2 * H])
    return out


def _pad_rows_two_block(w, H, HP, C, CP):
    """(2H, C) weight block -> (2*HP, CP) matching the padded concat layout."""
    out = jnp.zeros((2 * HP, CP), jnp.float32)
    out = out.at[:H, :C].set(w[:H])
    out = out.at[HP:HP + H, :C].set(w[H:2 * H])
    return out


# --------------------------------- forward --------------------------------- #

def h2gcn_forward(x, graph, params):
    N, F = x.shape
    assert N == graph['N']
    NP = graph['NP']
    a_st = graph['a_st']
    H = params['mlp_w'][-1].shape[1]
    C = params['bf'].shape[0]
    assert params['wf'].shape[0] == 7 * H
    FP, HP, CP = round_up(F, LANE), round_up(H, LANE), round_up(C, LANE)

    cap = _vmem_capacity_bytes()
    vmem_limit = _vmem_limit_bytes(cap)
    budget = int(0.75 * vmem_limit)        # leave headroom for compiler scratch

    # ---- fold / pad parameters (small, host-side, f32; projection weights -> bf16)
    ws, bs = _fold_mlp_bn(params)
    ws_p, bs_p = [], []
    for li, (w, b) in enumerate(zip(ws, bs)):
        rin = FP if li == 0 else HP
        ws_p.append(_pad2(w, rin, HP))
        bs_p.append(_pad2(b.reshape(1, -1), 1, HP))

    scale0_p = _pad_feat_two_block(params['bn0_scale'], H, HP)
    shift0_p = _pad_feat_two_block(params['bn0_shift'], H, HP)

    bf16 = jnp.bfloat16
    wf, bfin = params['wf'], params['bf']
    wf0_p = _pad2(wf[0:H], HP, CP).astype(bf16)
    wf1_p = _pad_rows_two_block(wf[H:3 * H], H, HP, C, CP).astype(bf16)
    wf2a_p = _pad_rows_two_block(wf[3 * H:5 * H], H, HP, C, CP).astype(bf16)
    wf2b_p = _pad_rows_two_block(wf[5 * H:7 * H], H, HP, C, CP).astype(bf16)
    bf_p = _pad2(bfin.reshape(1, -1), 1, CP)

    # ---- VMEM-aware per-kernel tile selection
    wbytes = int(sum(int(np.prod(w.shape)) for w in ws_p)) * 4 + len(bs_p) * HP * 4

    def mlp_step_bytes(rt):
        return 2 * (rt * FP * 4 + rt * HP * 2) + 2 * wbytes

    def conv_step_bytes(rt, kt):   # conservative: the larger (final-kernel) footprint
        a_blk = 2 * (2 * rt * kt * 2)                    # stacked bf16 adjacency, 2 bufs
        x1k = 2 * (kt * 2 * HP * 2)                      # bf16 x1 K-slice, 2 bufs
        rowb = 2 * (rt * (2 * HP + HP) * 2)              # bf16 x1/x0 row tiles, 2 bufs
        wts = 2 * ((HP + 3 * 2 * HP) * CP * 2 + CP * 4)  # resident projection weights
        outb = 2 * rt * max(2 * HP * 2, CP * 4)          # output block, 2 bufs
        acc = 2 * rt * 2 * HP * 4                        # f32 accumulator scratch
        return a_blk + x1k + rowb + wts + outb + acc

    rt_mlp = _pick_mlp_row_tile(NP, budget, mlp_step_bytes)
    rt_c, kt_c = _pick_conv_tiles(NP, budget, conv_step_bytes)

    # ---- pad the (small) feature matrix
    x_p = _pad2(x, NP, FP)

    # 1) feature_embed MLP + ReLU (one fused kernel, padded rows zeroed)   -> bf16
    x0_p = mlp_embed(x_p, ws_p, bs_p, N, rt=rt_mlp, vmem_limit=vmem_limit)
    # 2) conv0 + BatchNorm (eval) fused, K-tiled over the node axis        -> bf16
    x1_p = conv_bn(a_st, x0_p, scale0_p, shift0_p, rt=rt_c, kt=kt_c,
                   vmem_limit=vmem_limit)
    # 3) conv1 + JumpingKnowledge('cat') + final_project fused, K-tiled    -> f32
    out_p = conv_jump_project(a_st, x1_p, x0_p, wf0_p, wf1_p, wf2a_p, wf2b_p, bf_p,
                              rt=rt_c, kt=kt_c, vmem_limit=vmem_limit)
    return out_p[:N, :C]


def h2gcn_forward_ref(x, adj, adj2, params):
    """Plain-JAX f32 reference (eval-mode semantics)."""
    h = x
    M = len(params['mlp_w'])
    for i in range(M - 1):
        h = jnp.maximum(h @ params['mlp_w'][i] + params['mlp_b'][i], 0.0)
        h = h * params['mlp_bn_scale'][i] + params['mlp_bn_shift'][i]
        # dropout: identity in eval mode
    h = h @ params['mlp_w'][-1] + params['mlp_b'][-1]
    x0 = jnp.maximum(h, 0.0)
    x1 = jnp.concatenate([adj @ x0, adj2 @ x0], axis=1)
    x1 = x1 * params['bn0_scale'] + params['bn0_shift']
    x2 = jnp.concatenate([adj @ x1, adj2 @ x1], axis=1)
    xcat = jnp.concatenate([x0, x1, x2], axis=1)
    return xcat @ params['wf'] + params['bf']


# ---------------------------------- main ----------------------------------- #

if __name__ == "__main__":
    num_nodes = 200
    num_edges = 800
    in_channels, hidden_channels, out_channels = 16, 32, 8
    num_mlp_layers = 2       # exercises the in-MLP BN-fold path; default (1) also works
    num_layers = 2           # module default

    key = jax.random.PRNGKey(0)
    key, ke, kx, kp = jax.random.split(key, 4)

    edge_index = np.asarray(jax.random.randint(ke, (2, num_edges), 0, num_nodes))
    graph = preprocess_graph(edge_index, num_nodes)

    x = jax.random.normal(kx, (num_nodes, in_channels), jnp.float32)
    params = init_h2gcn_params(kp, in_channels, hidden_channels, out_channels,
                               num_mlp_layers=num_mlp_layers, num_layers=num_layers)

    out = h2gcn_forward(x, graph, params)
    out = jax.block_until_ready(out)

    with jax.default_matmul_precision("highest"):
        ref = h2gcn_forward_ref(x, graph['adj'], graph['adj2'], params)
    ref = jax.block_until_ready(ref)

    assert out.shape == (num_nodes, out_channels)
    max_err = float(jnp.max(jnp.abs(out - ref)))
    # bf16 MXU operands (f32 accumulation) -> relaxed tolerance vs the f32 reference.
    assert jnp.allclose(out, ref, atol=3e-2, rtol=3e-2), \
        f"mismatch vs reference (max abs err={max_err})"

    print("KERNEL_OK")
</pallas_src>

<mosaic_0001>
module attributes {stable_mosaic.version = 11 : i64} {
  func.func @kernel(%arg0: i32, %arg1: memref<128x128xf32, #tpu.memory_space<vmem>>, %arg2: memref<128x128xf32, #tpu.memory_space<vmem>>, %arg3: memref<1x128xf32, #tpu.memory_space<vmem>>, %arg4: memref<128x128xf32, #tpu.memory_space<vmem>>, %arg5: memref<1x128xf32, #tpu.memory_space<vmem>>, %arg6: memref<128x128xbf16, #tpu.memory_space<vmem>>) attributes {dimension_semantics = [#tpu.dimension_semantics<parallel>], iteration_bounds = array<i64: 2>, scalar_prefetch = 0 : i64, scratch_operands = 0 : i64, tpu.core_type = #tpu.core_type<tc>, window_params = [{transform_indices = @transform_0, window_bounds = array<i64: 128, 128>}, {pipeline_mode = #tpu.pipeline_mode<synchronous>, transform_indices = @transform_1, window_bounds = array<i64: 128, 128>}, {pipeline_mode = #tpu.pipeline_mode<synchronous>, transform_indices = @transform_2, window_bounds = array<i64: 1, 128>}, {pipeline_mode = #tpu.pipeline_mode<synchronous>, transform_indices = @transform_3, window_bounds = array<i64: 128, 128>}, {pipeline_mode = #tpu.pipeline_mode<synchronous>, transform_indices = @transform_4, window_bounds = array<i64: 1, 128>}, {transform_indices = @transform_5, window_bounds = array<i64: 128, 128>}]} {
    %c0 = arith.constant 0 : index
    %c0_0 = arith.constant 0 : index
    %0 = vector.load %arg1[%c0, %c0_0] : memref<128x128xf32, #tpu.memory_space<vmem>>, vector<128x128xf32>
    %c0_1 = arith.constant 0 : index
    %c0_2 = arith.constant 0 : index
    %1 = vector.load %arg2[%c0_1, %c0_2] : memref<128x128xf32, #tpu.memory_space<vmem>>, vector<128x128xf32>
    %c0_3 = arith.constant 0 : index
    %c0_4 = arith.constant 0 : index
    %2 = vector.load %arg3[%c0_3, %c0_4] : memref<1x128xf32, #tpu.memory_space<vmem>>, vector<1x128xf32>
    %cst = arith.constant dense<0.000000e+00> : vector<128x128xf32>
    %3 = tpu.matmul %0, %1, %cst {dimension_numbers = #tpu.dot_dimension_numbers<[1], [0], [0], [1], [0, 0, 1, 1], [], []>} : vector<128x128xf32>, vector<128x128xf32>, vector<128x128xf32> -> vector<128x128xf32>
    %4 = vector.broadcast %2 : vector<1x128xf32> to vector<128x128xf32>
    %5 = arith.addf %3, %4 : vector<128x128xf32>
    %cst_5 = arith.constant 0.000000e+00 : f32
    %6 = vector.broadcast %cst_5 : f32 to vector<128x128xf32>
    %7 = arith.maximumf %5, %6 : vector<128x128xf32>
    %c0_6 = arith.constant 0 : index
    %c0_7 = arith.constant 0 : index
    %8 = vector.load %arg4[%c0_6, %c0_7] : memref<128x128xf32, #tpu.memory_space<vmem>>, vector<128x128xf32>
    %c0_8 = arith.constant 0 : index
    %c0_9 = arith.constant 0 : index
    %9 = vector.load %arg5[%c0_8, %c0_9] : memref<1x128xf32, #tpu.memory_space<vmem>>, vector<1x128xf32>
    %cst_10 = arith.constant dense<0.000000e+00> : vector<128x128xf32>
    %10 = tpu.matmul %7, %8, %cst_10 {dimension_numbers = #tpu.dot_dimension_numbers<[1], [0], [0], [1], [0, 0, 1, 1], [], []>} : vector<128x128xf32>, vector<128x128xf32>, vector<128x128xf32> -> vector<128x128xf32>
    %11 = vector.broadcast %9 : vector<1x128xf32> to vector<128x128xf32>
    %12 = arith.addf %10, %11 : vector<128x128xf32>
    %cst_11 = arith.constant 0.000000e+00 : f32
    %13 = vector.broadcast %cst_11 : f32 to vector<128x128xf32>
    %14 = arith.maximumf %12, %13 : vector<128x128xf32>
    %c128_i32 = arith.constant 128 : i32
    %15 = arith.muli %arg0, %c128_i32 : i32
    %16 = tpu.iota {dimensions = array<i32: 0>} : vector<128x128xi32>
    %17 = vector.broadcast %15 : i32 to vector<128x128xi32>
    %18 = arith.addi %17, %16 : vector<128x128xi32>
    %c200_i32 = arith.constant 200 : i32
    %19 = vector.broadcast %c200_i32 : i32 to vector<128x128xi32>
    %20 = arith.cmpi slt, %18, %19 : vector<128x128xi32>
    %cst_12 = arith.constant 0.000000e+00 : f32
    %21 = vector.broadcast %cst_12 : f32 to vector<128x128xf32>
    %22 = arith.select %20, %14, %21 : vector<128x128xi1>, vector<128x128xf32>
    %23 = arith.truncf %22 : vector<128x128xf32> to vector<128x128xbf16>
    %c0_13 = arith.constant 0 : index
    %c0_14 = arith.constant 0 : index
    %24 = vector.load %arg6[%c0_13, %c0_14] : memref<128x128xbf16, #tpu.memory_space<vmem>>, vector<128x128xbf16>
    tpu.vector_store %arg6[%c0_13, %c0_14], %23 {strides = array<i32>} : memref<128x128xbf16, #tpu.memory_space<vmem>>, vector<128x128xbf16>,
    return
  }
  func.func @transform_0(%arg0: i32) -> (i32, i32) {
    %c0_i32 = arith.constant 0 : i32
    %c0_i32_0 = arith.constant 0 : i32
    return %arg0, %c0_i32 : i32, i32
  }
  func.func @transform_1(%arg0: i32) -> (i32, i32) {
    %c0_i32 = arith.constant 0 : i32
    %c0_i32_0 = arith.constant 0 : i32
    %c0_i32_1 = arith.constant 0 : i32
    return %c0_i32, %c0_i32_0 : i32, i32
  }
  func.func @transform_2(%arg0: i32) -> (i32, i32) {
    %c0_i32 = arith.constant 0 : i32
    %c0_i32_0 = arith.constant 0 : i32
    %c0_i32_1 = arith.constant 0 : i32
    return %c0_i32, %c0_i32_0 : i32, i32
  }
  func.func @transform_3(%arg0: i32) -> (i32, i32) {
    %c0_i32 = arith.constant 0 : i32
    %c0_i32_0 = arith.constant 0 : i32
    %c0_i32_1 = arith.constant 0 : i32
    return %c0_i32, %c0_i32_0 : i32, i32
  }
  func.func @transform_4(%arg0: i32) -> (i32, i32) {
    %c0_i32 = arith.constant 0 : i32
    %c0_i32_0 = arith.constant 0 : i32
    %c0_i32_1 = arith.constant 0 : i32
    return %c0_i32, %c0_i32_0 : i32, i32
  }
  func.func @transform_5(%arg0: i32) -> (i32, i32) {
    %c0_i32 = arith.constant 0 : i32
    %c0_i32_0 = arith.constant 0 : i32
    return %arg0, %c0_i32 : i32, i32
  }
}

</mosaic_0001>

<bundles_post_ra>
// kernel: tpu_custom_call.1
= control target key start
LH: loop header
LB: loop body
LE: loop exit
PB: predicated region body
PF: predicated region fallthrough
CT: control target
= control target key end

     0   :  { %10 = vsyncpa [#allocation3], 0  ;;  %s1855_s0 = inlined_call_operand.hbm [shape: f32[256,128], index: 0, kind: input, shape index: {}]   ;;  %s1856_s1 = inlined_call_operand.hbm [shape: f32[128,128], index: 1, kind: input, shape index: {}]   ;;  %s1857_s2 = inlined_call_operand.vmem [shape: f32[1,128], index: 2, kind: input, shape index: {}]   ;;  %s1858_s3 = inlined_call_operand.hbm [shape: f32[128,128], index: 3, kind: input, shape index: {}]   ;;  %s1859_s4 = inlined_call_operand.vmem [shape: f32[1,128], index: 4, kind: input, shape index: {}]   ;;  %s1860_s5 = inlined_call_operand.hbm [shape: bf16[256,128], index: 5, kind: output, shape index: {}]  }
   0x1   :  { %12 = vsyncpa [#allocation3 + $0x1], 0 }
   0x2   :  { %13 = vsyncpa [#allocation6], 0 }
   0x3   :  { %14 = vsyncpa [#allocation4], 0 }
   0x4   :  { %16 = vsyncpa [#allocation4 + $0x1], 0  ;;  %s1520_s18 = smov 0   ;;  %s1522_s19 = smov 0  }
   0x5   :  { %s1524_s20 = smov 0   ;;  %s1526_s21 = smov 0  }
   0x6 LB: > { %s1541_s22 = sadd.s32 4294967295, %s1480_s21   ;;  %s911_s23 = sadd.s32 4294967294, %s1480_s21   ;;  %s1480_s21 = sphi %s1526_s21, %s1880_s21   ;;  %s1476_s20 = sphi %s1524_s20, %s1879_s20   ;;  %s1472_s19 = sphi %s1522_s19, %s1878_s19   ;;  %s1468_s18 = sphi %s1520_s18, %s1877_s18  }
   0x7   : > { %p42_p0 = scmp.ne.s32.totalorder %s1472_s19, %s1468_s18  ;;  %p1861_p1 = scmp.eq.s32.totalorder %s1541_s22, 0 }
   0x8   : > { %p156_p3 = scmp.eq.s32.totalorder %s911_s23, 1  ;;  %p912_p5 = scmp.ge.s32.totalorder %s1480_s21, 1 }
   0x9   : > { %p1550_p4 = por %p1861_p1, %p42_p0  ;;  %p163_p7 = scmp.lt.s32.totalorder %s1480_s21, 3 }
   0xa   : > { %p1555_p6 = por %p156_p3, %p42_p0  ;;  %s1482_s27 = smov [#allocation5]  }
   0xb   : > { %s1864_s24 = scalar_select %p1550_p4, 1, 0 }
   0xc   : > { %s1865_s25 = scalar_select %p1555_p6, 1, 0 }
   0xd   : > { %p1560_p8 = pnand %p912_p5, %p163_p7  ;;  %s175_s28 = sshll.u32 %s1482_s27, 4  ;;  %s1564_s28 = int_to_ptr.vmem [resolvable:$true] %s175_s28 }
   0xe   : > { %s1483_s30 = smov [#allocation7]   ;;  %s1324_s9 = scalar_lea.hbm %s1856_s1, 2048 }
   0xf   : > { %p1265_p9 = pneg %p1560_p8  ;;  %s191_s6 = sshll.u32 %s1483_s30, 4  ;;  %s1575_s6 = int_to_ptr.vmem [resolvable:$true] %s191_s6 }
  0x10   : > { %p1325_p12 = scmp.ne.s32.totalorder %s1856_s1, %s1324_s9  ;;  %p1331_p5 = scmp.lt.u32.totalorder %s1324_s9, %s1856_s1 }
  0x11   : > { %p1571_p11 = pnand %p1265_p9, %p1861_p1 }
  0x13   : > { %p1326_p13 = pneg %p1571_p11 }
  0x15   : > { %p1327_p0 = pnand %p1326_p13, %p1325_p12 }
  0x17   : > { %p1328_p3 = pneg %p1327_p0 }
  0x19   : > { %p1333_p7 = pnand %p1331_p5, %p1328_p3 }
  0x1b   : > { %1336 = shalt.err (!%p1333_p7)
}
  0x1c   : > { %s1337_s14 = scalar_lea.vmem %s1564_s28, 2048  ;;  %p1345_p2 = scmp.lt.s32.totalorder %s1564_s28, %s1564_s28 }
  0x1d   : > { %p1338_p9 = scmp.ne.s32.totalorder %s1564_s28, %s1337_s14  ;;  %p1346_p12 = scmp.lt.s32.totalorder %s1337_s14, %s1337_s14 }
  0x1f   : > { %p1340_p10 = pnand %p1338_p9, %p1326_p13  ;;  %p1347_p0 = por %p1346_p12, %p1345_p2 }
  0x21   : > { %p1341_p1 = pneg %p1340_p10 }
  0x23   : > { %p1348_p6 = pnand %p1347_p0, %p1341_p1 }
  0x25   : > { %1351 = shalt.err (!%p1348_p6)
}
  0x26   : > { %s1484_s15 = smov 128   ;;  %s1485_s16 = smov 8  }
  0x27   : > { %1268 = dma.hbm_to_vmem [thread:$0]  (!%p1571_p11), %s1856_s1, 2048, %s1564_s28, [#allocation6], %s1484_s15, %s1484_s15, %s1485_s16  }
  0x28   : > { %s1352_s7 = scalar_lea.hbm %s1858_s3, 2048 }
  0x29   : > { %p1353_p1 = scmp.ne.s32.totalorder %s1858_s3, %s1352_s7  ;;  %p1359_p10 = scmp.lt.u32.totalorder %s1352_s7, %s1858_s3 }
  0x2b   : > { %p1355_p2 = pnand %p1353_p1, %p1326_p13 }
  0x2d   : > { %p1356_p6 = pneg %p1355_p2 }
  0x2f   : > { %p1361_p3 = pnand %p1359_p10, %p1356_p6 }
  0x31   : > { %1364 = shalt.err (!%p1361_p3)
}
  0x32   : > { %s1365_s28 = scalar_lea.vmem %s1575_s6, 2048  ;;  %p1373_p12 = scmp.lt.s32.totalorder %s1575_s6, %s1575_s6 }
  0x33   : > { %p1366_p5 = scmp.ne.s32.totalorder %s1575_s6, %s1365_s28  ;;  %p1374_p0 = scmp.lt.s32.totalorder %s1365_s28, %s1365_s28 }
  0x35   : > { %p1368_p7 = pnand %p1366_p5, %p1326_p13  ;;  %p1375_p1 = por %p1374_p0, %p1373_p12 }
  0x37   : > { %p1369_p9 = pneg %p1368_p7 }
  0x39   : > { %p1376_p2 = pnand %p1375_p1, %p1369_p9 }
  0x3b   : > { %1379 = shalt.err (!%p1376_p2)
}
  0x3c   : > { %1271 = dma.hbm_to_vmem [thread:$0]  (!%p1571_p11), %s1858_s3, 2048, %s1575_s6, [#allocation6], %s1484_s15, %s1484_s15, %s1485_s16  }
  0x3d   : > { %s1636_s29 = sadd.s32 1, %s1480_s21   ;;  %s29_s14 = sadd.s32 1, %s1476_s20 }
  0x3e   : > { %s26_s17 = ssub.s32 %s1480_s21, %s1636_s29  ;;  %p36_p13 = scmp.ne.s32.totalorder %s1476_s20, %s1472_s19 }
  0x3f   : > { %p27_p6 = scmp.eq.s32.totalorder %s26_s17, 0  ;;  %p37_p10 = scmp.eq.s32.totalorder %s1480_s21, 0 }
  0x40   : > { %p1868_p3 = scmp.eq.s32.totalorder %s1541_s22, 1  ;;  %p1282_p7 = scmp.lt.s32.totalorder %s1480_s21, 2 }
  0x41   : > { %s1652_s27 = scalar_select %p27_p6, %s1476_s20, %s29_s14  }
  0x42   : > { %p1646_p5 = por %p1868_p3, %p36_p13  ;;  %p38_p9 = por %p37_p10, %p36_p13 }
  0x43   : > { %s208_s30 = sand.u32 1, %s1476_s20   ;;  %s948_s6 = sshll.u32 %s1480_s21, 11 }
  0x44   : > { %s1869_s23 = scalar_select %p1646_p5, 1, 0 }
  0x45   : > { %s916_s7 = sshll.u32 %s208_s30, 7  ;;  %s1659_s10 = scalar_lea.hbm %s1855_s0, %s948_s6 }
  0x46   : > { %s212_s11 = scalar_lea.vmem [#allocation2], %s916_s7  ;;  %p1663_p11 = pnand %p1282_p7, %p38_p9 }
  0x47   : > { %s219_s28 = sshll.u32 %s212_s11, 4  ;;  %s1667_s13 = scalar_lea.sflag [#allocation3], %s208_s30  ;;  %s1661_s28 = int_to_ptr.vmem [resolvable:$true] %s219_s28 }
  0x48   : > { %s1380_s14 = scalar_lea.hbm %s1659_s10, 2048  ;;  %p1382_p0 = pneg %p1663_p11 }
  0x49   : > { %p1381_p12 = scmp.ne.s32.totalorder %s1659_s10, %s1380_s14  ;;  %s1385_s6 = scalar_lea.hbm %s1855_s0, 4096 }
  0x4a   : > { %p1386_p13 = scmp.lt.u32.totalorder %s1659_s10, %s1855_s0  ;;  %p1387_p6 = scmp.lt.u32.totalorder %s1385_s6, %s1380_s14 }
  0x4b   : > { %p1383_p1 = pnand %p1382_p0, %p1381_p12  ;;  %p1389_p3 = scmp.lt.u32.totalorder %s1380_s14, %s1659_s10 }
  0x4c   : > { %p1388_p10 = por %p1387_p6, %p1386_p13 }
  0x4d   : > { %p1384_p2 = pneg %p1383_p1 }
  0x4e   : > { %p1390_p7 = por %p1389_p3, %p1388_p10 }
  0x50   : > { %p1391_p9 = pnand %p1390_p7, %p1384_p2 }
  0x52   : > { %1394 = shalt.err (!%p1391_p9)
}
  0x53   : > { %s1395_s30 = scalar_lea.vmem %s1661_s28, 2048  ;;  %s1486_s11 = smov [#allocation2]  }
  0x54   : > { %p1396_p12 = scmp.ne.s32.totalorder %s1661_s28, %s1395_s30  ;;  %s1400_s17 = sshll.u32 %s1486_s11, 4  ;;  %s1401_s17 = int_to_ptr.vmem [resolvable:$false] %s1400_s17 }
  0x55   : > { %s1402_s7 = scalar_lea.vmem %s1401_s17, 4096  ;;  %p1403_p4 = scmp.lt.s32.totalorder %s1661_s28, %s1401_s17 }
  0x56   : > { %p1398_p1 = pnand %p1396_p12, %p1382_p0  ;;  %p1404_p13 = scmp.lt.s32.totalorder %s1402_s7, %s1395_s30 }
  0x58   : > { %p1399_p5 = pneg %p1398_p1  ;;  %p1405_p6 = por %p1404_p13, %p1403_p4 }
  0x5a   : > { %p1406_p10 = pnand %p1405_p6, %p1399_p5 }
  0x5c   : > { %1409 = shalt.err (!%p1406_p10)
}
  0x5d   : > { %1275 = dma.hbm_to_vmem [thread:$0]  (!%p1663_p11), %s1659_s10, 2048, %s1661_s28, %s1667_s13, %s1484_s15, %s1484_s15, %s1485_s16  }
  0x5e   : > { %231 = sbr.rel (%p1560_p8) target bundleno = 621 (0x26d), region = 40  ;;  %s1701_s14 = sand.u32 (!%p1560_p8), 1, %s1472_s19  }
  0x5f   : > { %s920_s6 = sshll.u32 (!%p1560_p8), %s1701_s14, 7  ;;  %s234_s8 = scalar_lea.sflag (!%p1560_p8), [#allocation3], %s1701_s14 }
  0x60   : > { %s1705_s9 = scalar_lea.vmem (!%p1560_p8), [#allocation2], %s920_s6  ;;  %p1871_p4 = scmp.ne.s32.totalorder (!%p1560_p8), %s1864_s24, 0 }
  0x65   : > { %1455 = dma.done.wait (%p1871_p4), %s234_s8, 2048  }
  0x66   : > { %1457 = vsyncadd (%p1871_p4), %s234_s8, 4294965248  ;;  %p1872_p5 = scmp.eq.s32.totalorder %s1541_s22, 0 }
  0x68   : > { %1459 = dma.done.wait (%p1872_p5), [#allocation6], 4096   ;;  %p1873_p8 = pmov %p1872_p5 }
  0x69   : > { %v290_v0 = vld [vmem:[#allocation5] sm:$0xff]  ;;  %v291_v1 = vld [vmem:[#allocation5 + $0x8] sm:$0xff]  ;;  %v292_v2 = vld [vmem:[#allocation5 + $0x10] sm:$0xff]  ;;  %s926_s15 = sshll.u32 %s1541_s22, 7  ;;  %s923_s28 = sshll.u32 %s1701_s14, 6 }
  0x6a   : > { %1461 = vsyncadd (%p1873_p8), [#allocation6], 4294963200  ;;  %v1189_v3 = vpack.c.bf16 %v291_v1, %v290_v0  ;;  %v293_v4 = vld [vmem:[#allocation5 + $0x18] sm:$0xff]  ;;  %v294_v6 = vld [vmem:[#allocation5 + $0x20] sm:$0xff]  ;;  %s1763_s12 = scalar_lea.vmem [#allocation8], %s923_s28  ;;  %s965_s13 = sshll.u32 %s1541_s22, 10 }
  0x6b   : > { %v1193_v5 = vpack.c.bf16 %v293_v4, %v292_v2  ;;  %v295_v7 = vld [vmem:[#allocation5 + $0x28] sm:$0xff]  ;;  %v274_v9 = vld [vmem:[%s1705_s9] sm:$0xff]  ;;  %v296_v10 = vld [vmem:[#allocation5 + $0x30] sm:$0xff]  ;;  %s819_s30 = sshll.u32 %s1763_s12, 4  ;;  %s1808_s7 = scalar_lea.hbm %s1860_s5, %s965_s13  ;;  %s1810_s30 = int_to_ptr.vmem [resolvable:$true] %s819_s30 }
  0x6c   : > { %1190 = vmatprep.subr.bf16.mxu0 %v1189_v3  ;;  %v1197_v8 = vpack.c.bf16 %v295_v7, %v294_v6  ;;  %v297_v11 = vld [vmem:[#allocation5 + $0x38] sm:$0xff]  ;;  %1109 = vmatprep.mubr.f32.mxu0 %v274_v9  ;;  %v298_v13 = vld [vmem:[#allocation5 + $0x40] sm:$0xff]  ;;  %v299_v14 = vld [vmem:[#allocation5 + $0x48] sm:$0xff]  ;;  %s806_s6 = scalar_lea.sflag [#allocation4], %s1701_s14  ;;  %s1410_s8 = scalar_lea.vmem %s1810_s30, 1024 }
  0x6d   : > { %1192 = vmatpush3.bf16.msra.mxu0 %v1189_v3  ;;  %v1201_v12 = vpack.c.bf16 %v297_v11, %v296_v10  ;;  %v474_v15 = vld [vmem:[#allocation7] sm:$0xff]  ;;  %v475_v16 = vld [vmem:[#allocation7 + $0x8] sm:$0xff]  ;;  %v476_v17 = vld [vmem:[#allocation7 + $0x10] sm:$0xff]  ;;  %v1205_v21 = vpack.c.bf16 %v299_v14, %v298_v13  ;;  %p1411_p11 = scmp.ne.s32.totalorder %s1810_s30, %s1410_s8  ;;  %p1874_p0 = scmp.ne.s32.totalorder %s1869_s23, 0 }
  0x6e   : > { %1194 = vmatprep.subr.bf16.mxu0 %v1193_v5  ;;  %v477_v18 = vld [vmem:[#allocation7 + $0x18] sm:$0xff]  ;;  %v1221_v19 = vpack.c.bf16 %v475_v16, %v474_v15  ;;  %v478_v22 = vld [vmem:[#allocation7 + $0x20] sm:$0xff]  ;;  %v479_v23 = vld [vmem:[#allocation7 + $0x28] sm:$0xff]  ;;  %s1487_s22 = smov [#allocation8]  }
  0x6f   : > { %v1225_v20 = vpack.c.bf16 %v477_v18, %v476_v17  ;;  %v300_v24 = vld [vmem:[#allocation5 + $0x50] sm:$0xff]  ;;  %v301_v25 = vld [vmem:[#allocation5 + $0x58] sm:$0xff]  ;;  %v1229_v26 = vpack.c.bf16 %v479_v23, %v478_v22  ;;  %v302_v30 = vld [vmem:[#allocation5 + $0x60] sm:$0xff]  ;;  %p1412_p2 = pnand %p1411_p11, %p1874_p0 }
  0x70   : > { %1222 = vmatprep.subr.bf16.mxu1 %v1221_v19  ;;  %v1209_v27 = vpack.c.bf16 %v301_v25, %v300_v24  ;;  %v480_v28 = vld [vmem:[#allocation7 + $0x30] sm:$0xff]  ;;  %v481_v29 = vld [vmem:[#allocation7 + $0x38] sm:$0xff]  ;;  %v303_v31 = vld [vmem:[#allocation5 + $0x68] sm:$0xff] }
  0x71   : > { %1196 = vmatpush3.bf16.msra.mxu0 %v1193_v5  ;;  %1224 = vmatpush3.bf16.msra.mxu1 %v1221_v19  ;;  %v1233_v32 = vpack.c.bf16 %v481_v29, %v480_v28  ;;  %v1213_v33 = vpack.c.bf16 %v303_v31, %v302_v30  ;;  %v482_v34 = vld [vmem:[#allocation7 + $0x40] sm:$0xff]  ;;  %v483_v35 = vld [vmem:[#allocation7 + $0x48] sm:$0xff]  ;;  %v304_v36 = vld [vmem:[#allocation5 + $0x70] sm:$0xff]  ;;  %p1413_p3 = pneg %p1412_p2 }
  0x72   : > { %1198 = vmatprep.subr.bf16.mxu0 %v1197_v8  ;;  %1226 = vmatprep.subr.bf16.mxu1 %v1225_v20  ;;  %v305_v37 = vld [vmem:[#allocation5 + $0x78] sm:$0xff]  ;;  %v1237_v38 = vpack.c.bf16 %v483_v35, %v482_v34  ;;  %v484_v40 = vld [vmem:[#allocation7 + $0x50] sm:$0xff]  ;;  %v486_v43 = vld [vmem:[#allocation7 + $0x60] sm:$0xff] }
  0x73   : > { %v1217_v39 = vpack.c.bf16 %v305_v37, %v304_v36  ;;  %v485_v41 = vld [vmem:[#allocation7 + $0x58] sm:$0xff]  ;;  %v487_v44 = vld [vmem:[#allocation7 + $0x68] sm:$0xff]  ;;  %v276_v47 = vld [vmem:[%s1705_s9 + $0x10] sm:$0xff] }
  0x74   : > { %v1241_v42 = vpack.c.bf16 %v485_v41, %v484_v40  ;;  %v275_v45 = vld [vmem:[%s1705_s9 + $0x8] sm:$0xff]  ;;  %v1245_v46 = vpack.c.bf16 %v487_v44, %v486_v43  ;;  %v277_v48 = vld [vmem:[%s1705_s9 + $0x18] sm:$0xff]  ;;  %v278_v49 = vld [vmem:[%s1705_s9 + $0x20] sm:$0xff] }
  0x75   : > { %1200 = vmatpush3.bf16.msra.mxu0 %v1197_v8  ;;  %1228 = vmatpush3.bf16.msra.mxu1 %v1225_v20  ;;  %v279_v50 = vld [vmem:[%s1705_s9 + $0x28] sm:$0xff]  ;;  %v280_v51 = vld [vmem:[%s1705_s9 + $0x30] sm:$0xff]  ;;  %v281_v52 = vld [vmem:[%s1705_s9 + $0x38] sm:$0xff] }
  0x76   : > { %1202 = vmatprep.subr.bf16.mxu0 %v1201_v12  ;;  %1230 = vmatprep.subr.bf16.mxu1 %v1229_v26  ;;  %v282_v53 = vld [vmem:[%s1705_s9 + $0x40] sm:$0xff]  ;;  %v283_v54 = vld [vmem:[%s1705_s9 + $0x48] sm:$0xff]  ;;  %v284_v55 = vld [vmem:[%s1705_s9 + $0x50] sm:$0xff] }
  0x77   : > { %v285_v56 = vld [vmem:[%s1705_s9 + $0x58] sm:$0xff]  ;;  %v286_v57 = vld [vmem:[%s1705_s9 + $0x60] sm:$0xff]  ;;  %v287_v58 = vld [vmem:[%s1705_s9 + $0x68] sm:$0xff] }
  0x78   : > { %v288_v59 = vld [vmem:[%s1705_s9 + $0x70] sm:$0xff]  ;;  %v289_v60 = vld [vmem:[%s1705_s9 + $0x78] sm:$0xff]  ;;  %v924_v0 = vld [vmem:[%s1857_s2] ss:$0 sm:$0xff]  ;;  %s1414_s9 = sshll.u32 %s1487_s22, 4  ;;  %s1415_s9 = int_to_ptr.vmem [resolvable:$false] %s1414_s9 }
  0x79   : > { %1204 = vmatpush3.bf16.msra.mxu0 %v1201_v12  ;;  %1232 = vmatpush3.bf16.msra.mxu1 %v1229_v26  ;;  %v488_v61 = vld [vmem:[#allocation7 + $0x70] sm:$0xff]  ;;  %v489_v62 = vld [vmem:[#allocation7 + $0x78] sm:$0xff]  ;;  %s1416_s24 = scalar_lea.vmem %s1415_s9, 2048  ;;  %p1417_p7 = scmp.lt.s32.totalorder %s1810_s30, %s1415_s9 }
  0x7a   : > { %1206 = vmatprep.subr.bf16.mxu0 %v1205_v21  ;;  %1234 = vmatprep.subr.bf16.mxu1 %v1233_v32  ;;  %v1249_v63 = vpack.c.bf16 %v489_v62, %v488_v61  ;;  %p1418_p9 = scmp.lt.s32.totalorder %s1416_s24, %s1410_s8 }
  0x7c   : > { %p1419_p12 = por %p1418_p9, %p1417_p7 }
  0x7d   : > { %1208 = vmatpush3.bf16.msra.mxu0 %v1205_v21  ;;  %1236 = vmatpush3.bf16.msra.mxu1 %v1233_v32 }
  0x7e   : > { %1210 = vmatprep.subr.bf16.mxu0 %v1209_v27  ;;  %1238 = vmatprep.subr.bf16.mxu1 %v1237_v38  ;;  %p1420_p1 = pnand %p1419_p12, %p1413_p3 }
  0x81   : > { %1212 = vmatpush3.bf16.msra.mxu0 %v1209_v27  ;;  %1240 = vmatpush3.bf16.msra.mxu1 %v1237_v38 }
  0x82   : > { %1214 = vmatprep.subr.bf16.mxu0 %v1213_v33  ;;  %1242 = vmatprep.subr.bf16.mxu1 %v1241_v42 }
  0x85   : > { %1216 = vmatpush3.bf16.msra.mxu0 %v1213_v33  ;;  %1244 = vmatpush3.bf16.msra.mxu1 %v1241_v42 }
  0x86   : > { %1218 = vmatprep.subr.bf16.mxu0 %v1217_v39  ;;  %1246 = vmatprep.subr.bf16.mxu1 %v1245_v46 }
  0x89   : > { %1220 = vmatpush3.bf16.msra.mxu0 %v1217_v39  ;;  %1248 = vmatpush3.bf16.msra.mxu1 %v1245_v46 }
  0x8a   : > { %1250 = vmatprep.subr.bf16.mxu1 %v1249_v63 }
  0x8c   : > { %1110 = vmatmul.mubr.f32.vlgmr.msra.gmra.mrb[0].mxu0 %v275_v45 }
  0x8d   : > { %1112 = vmatprep.mubr.f32.mxu0 %v276_v47  ;;  %1252 = vmatpush3.bf16.msra.mxu1 %v1249_v63 }
  0x90   : > { %1113 = vmatmul.mubr.f32.gmra.mrb[2].mxu0 %v277_v48 }
  0x91   : > { %1115 = vmatprep.mubr.f32.mxu0 %v278_v49  ;;  %v659_v49 = vlaneseq }
  0x94   : > { %1116 = vmatmul.mubr.f32.gmra.mrb[4].mxu0 %v279_v50  ;;  %v1734_v50 = vshrl.u32 %v659_v49, 7 }
  0x95   : > { %1118 = vmatprep.mubr.f32.mxu0 %v280_v51 }
  0x96   : > { %v661_v51 = vadd.s32 8, %v1734_v50  ;;  %v665_v61 = vadd.s32 40, %v1734_v50  ;;  %v664_v62 = vadd.s32 32, %v1734_v50 }
  0x98   : > { %1119 = vmatmul.mubr.f32.gmra.mrb[6].mxu0 %v281_v52  ;;  %v1738_v52 = vstv %s926_s15 }
  0x99   : > { %1121 = vmatprep.mubr.f32.mxu0 %v282_v53  ;;  %v1743_v53 = vld [vmem:[%s1859_s4] ss:$0 sm:$0xff] }
  0x9c   : > { %1122 = vmatmul.mubr.f32.gmra.mrb[8].mxu0 %v283_v54  ;;  %v678_v54 = vadd.s32 %v1738_v52, %v661_v51 }
  0x9d   : > { %1124 = vmatprep.mubr.f32.mxu0 %v284_v55  ;;  %v663_v55 = vadd.s32 24, %v1734_v50 }
  0x9e   : > { %vm694_vm0 = vcmp.lt.s32.totalorder %v678_v54, 200  ;;  %v673_v54 = vadd.s32 104, %v1734_v50 }
  0xa0   : > { %1125 = vmatmul.mubr.f32.gmra.mrb[10].mxu0 %v285_v56  ;;  %v677_v56 = vadd.s32 %v1738_v52, %v1734_v50 }
  0xa1   : > { %1127 = vmatprep.mubr.f32.mxu0 %v286_v57  ;;  %v662_v57 = vadd.s32 16, %v1734_v50 }
  0xa2   : > { %vm693_vm1 = vcmp.lt.s32.totalorder %v677_v56, 200 }
  0xa4   : > { %1128 = vmatmul.mubr.f32.gmra.mrb[12].mxu0 %v287_v58 }
  0xa5   : > { %1130 = vmatprep.mubr.f32.mxu0 %v288_v59 }
  0xa8   : > { %1131 = vmatmul.mubr.f32.gmra.mrb[14].mxu0 %v289_v60 }
 0x15f   : > { %v1111_v1 = vpop.f32.mrb[0].mxu0 }
 0x160   : > { %v385_v2 = vadd.f32 %v1111_v1, %v924_v0  ;;  %v379_v3 = vpop.f32.mrb[1].mxu0 }
 0x161   : > { %v380_v4 = vadd.f32 %v924_v0, %v379_v3 }
 0x162   : > { %v459_v7 = vmax.f32 %v385_v2, 0.0  ;;  %v679_v2 = vadd.s32 %v1738_v52, %v662_v57  ;;  %v672_v57 = vadd.s32 96, %v1734_v50 }
 0x163   : > { %v1114_v5 = vpop.f32.mrb[2].mxu0  ;;  %v458_v6 = vmax.f32 %v380_v4, 0.0 }
 0x164   : > { %v395_v8 = vadd.f32 %v1114_v5, %v924_v0  ;;  %v389_v9 = vpop.f32.mrb[3].mxu0  ;;  %vm695_vm3 = vcmp.lt.s32.totalorder %v679_v2, 200  ;;  %v675_v2 = vadd.s32 120, %v1734_v50 }
 0x165   : > { %v390_v10 = vadd.f32 %v924_v0, %v389_v9  ;;  %1165 = vmatprep.mubr.f32.mxu1 %v458_v6  ;;  %v681_v9 = vadd.s32 %v1738_v52, %v664_v62 }
 0x166   : > { %1166 = vmatmul.mubr.f32.vlgmr.msra.gmra.mrb[0].mxu1 %v459_v7  ;;  %v461_v13 = vmax.f32 %v395_v8, 0.0  ;;  %v682_v8 = vadd.s32 %v1738_v52, %v665_v61 }
 0x167   : > { %v460_v11 = vmax.f32 %v390_v10, 0.0  ;;  %v1117_v12 = vpop.f32.mrb[4].mxu0  ;;  %vm697_vm5 = vcmp.lt.s32.totalorder %v681_v9, 200 }
 0x168   : > { %v405_v14 = vadd.f32 %v1117_v12, %v924_v0  ;;  %v399_v15 = vpop.f32.mrb[5].mxu0  ;;  %v667_v12 = vadd.s32 56, %v1734_v50  ;;  %vm698_vm4 = vcmp.lt.s32.totalorder %v682_v8, 200 }
 0x169   : > { %v400_v16 = vadd.f32 %v924_v0, %v399_v15  ;;  %1168 = vmatprep.mubr.f32.mxu1 %v460_v11  ;;  %v666_v15 = vadd.s32 48, %v1734_v50 }
 0x16a   : > { %1169 = vmatmul.mubr.f32.gmra.mrb[2].mxu1 %v461_v13  ;;  %v463_v19 = vmax.f32 %v405_v14, 0.0 }
 0x16b   : > { %v462_v17 = vmax.f32 %v400_v16, 0.0  ;;  %v1120_v18 = vpop.f32.mrb[6].mxu0 }
 0x16c   : > { %v415_v20 = vadd.f32 %v1120_v18, %v924_v0  ;;  %v409_v21 = vpop.f32.mrb[7].mxu0 }
 0x16d   : > { %v410_v22 = vadd.f32 %v924_v0, %v409_v21  ;;  %1171 = vmatprep.mubr.f32.mxu1 %v462_v17 }
 0x16e   : > { %1172 = vmatmul.mubr.f32.gmra.mrb[4].mxu1 %v463_v19  ;;  %v465_v25 = vmax.f32 %v415_v20, 0.0 }
 0x16f   : > { %v464_v23 = vmax.f32 %v410_v22, 0.0  ;;  %v1123_v24 = vpop.f32.mrb[8].mxu0 }
 0x170   : > { %v425_v26 = vadd.f32 %v1123_v24, %v924_v0  ;;  %v419_v27 = vpop.f32.mrb[9].mxu0  ;;  %v669_v24 = vadd.s32 72, %v1734_v50 }
 0x171   : > { %v420_v28 = vadd.f32 %v924_v0, %v419_v27  ;;  %1174 = vmatprep.mubr.f32.mxu1 %v464_v23  ;;  %v684_v23 = vadd.s32 %v1738_v52, %v667_v12  ;;  %v683_v27 = vadd.s32 %v1738_v52, %v666_v15 }
 0x172   : > { %1175 = vmatmul.mubr.f32.gmra.mrb[6].mxu1 %v465_v25  ;;  %v467_v31 = vmax.f32 %v425_v26, 0.0 }
 0x173   : > { %v466_v29 = vmax.f32 %v420_v28, 0.0  ;;  %v1126_v30 = vpop.f32.mrb[10].mxu0  ;;  %v668_v28 = vadd.s32 64, %v1734_v50  ;;  %vm700_vm6 = vcmp.lt.s32.totalorder %v684_v23, 200  ;;  %vm699_vm7 = vcmp.lt.s32.totalorder %v683_v27, 200 }
 0x174   : > { %v435_v32 = vadd.f32 %v1126_v30, %v924_v0  ;;  %v429_v33 = vpop.f32.mrb[11].mxu0 }
 0x175   : > { %v430_v34 = vadd.f32 %v924_v0, %v429_v33  ;;  %1177 = vmatprep.mubr.f32.mxu1 %v466_v29 }
 0x176   : > { %1178 = vmatmul.mubr.f32.gmra.mrb[8].mxu1 %v467_v31  ;;  %v469_v37 = vmax.f32 %v435_v32, 0.0 }
 0x177   : > { %v468_v35 = vmax.f32 %v430_v34, 0.0  ;;  %v1129_v36 = vpop.f32.mrb[12].mxu0  ;;  %v671_v34 = vadd.s32 88, %v1734_v50 }
 0x178   : > { %v445_v38 = vadd.f32 %v1129_v36, %v924_v0  ;;  %v439_v39 = vpop.f32.mrb[13].mxu0 }
 0x179   : > { %v440_v40 = vadd.f32 %v924_v0, %v439_v39  ;;  %1180 = vmatprep.mubr.f32.mxu1 %v468_v35  ;;  %v670_v35 = vadd.s32 80, %v1734_v50 }
 0x17a   : > { %1181 = vmatmul.mubr.f32.gmra.mrb[10].mxu1 %v469_v37  ;;  %v471_v43 = vmax.f32 %v445_v38, 0.0  ;;  %v686_v38 = vadd.s32 %v1738_v52, %v669_v24 }
 0x17b   : > { %v470_v41 = vmax.f32 %v440_v40, 0.0  ;;  %v1132_v42 = vpop.f32.mrb[14].mxu0 }
 0x17c   : > { %v455_v44 = vadd.f32 %v1132_v42, %v924_v0  ;;  %v449_v45 = vpop.f32.mrb[15].mxu0  ;;  %vm702_vm8 = vcmp.lt.s32.totalorder %v686_v38, 200 }
 0x17d   : > { %v450_v46 = vadd.f32 %v924_v0, %v449_v45  ;;  %1183 = vmatprep.mubr.f32.mxu1 %v470_v41  ;;  %v680_v0 = vadd.s32 %v1738_v52, %v663_v55  ;;  %v685_v41 = vadd.s32 %v1738_v52, %v668_v28 }
 0x17e   : > { %1184 = vmatmul.mubr.f32.gmra.mrb[12].mxu1 %v471_v43  ;;  %v473_v48 = vmax.f32 %v455_v44, 0.0 }
 0x17f   : > { %v472_v47 = vmax.f32 %v450_v46, 0.0  ;;  %vm696_vm2 = vcmp.lt.s32.totalorder %v680_v0, 200  ;;  %vm701_vm9 = vcmp.lt.s32.totalorder %v685_v41, 200 }
 0x181   : > { %1186 = vmatprep.mubr.f32.mxu1 %v472_v47  ;;  %v688_v47 = vadd.s32 %v1738_v52, %v671_v34 }
 0x182   : > { %1187 = vmatmul.mubr.f32.gmra.mrb[14].mxu1 %v473_v48  ;;  %v687_v48 = vadd.s32 %v1738_v52, %v670_v35 }
 0x183   : > { %vm704_vm10 = vcmp.lt.s32.totalorder %v688_v47, 200 }
 0x184   : > { %vm703_vm11 = vcmp.lt.s32.totalorder %v687_v48, 200 }
 0x239   : > { %v1167_v58 = vpop.f32.mrb[0].mxu1 }
 0x23a   : > { %v569_v59 = vadd.f32 %v1167_v58, %v1743_v53  ;;  %v563_v60 = vpop.f32.mrb[1].mxu1 }
 0x23b   : > { %v564_v63 = vadd.f32 %v1743_v53, %v563_v60 }
 0x23c   : > { %v643_v1 = vmax.f32 %v569_v59, 0.0 }
 0x23d   : > { %v642_v3 = vmax.f32 %v564_v63, 0.0  ;;  %v1170_v4 = vpop.f32.mrb[2].mxu1 }
 0x23e   : > { %v710_v5 = vsel %vm694_vm0, %v643_v1, 0.0  ;;  %v579_v6 = vadd.f32 %v1170_v4, %v1743_v53  ;;  %v573_v7 = vpop.f32.mrb[3].mxu1  ;;  %v690_v1 = vadd.s32 %v1738_v52, %v673_v54 }
 0x23f   : > { %v709_v10 = vsel %vm693_vm1, %v642_v3, 0.0  ;;  %v574_v11 = vadd.f32 %v1743_v53, %v573_v7 }
 0x240   : > { %v969_v13 = vpack.c.bf16 %v710_v5, %v709_v10  ;;  %v645_v14 = vmax.f32 %v579_v6, 0.0  ;;  %v689_v5 = vadd.s32 %v1738_v52, %v672_v57  ;;  %v674_v6 = vadd.s32 112, %v1734_v50 }
 0x241   : > { %v644_v16 = vmax.f32 %v574_v11, 0.0  ;;  %v1173_v17 = vpop.f32.mrb[4].mxu1  ;;  %vm706_vm12 = vcmp.lt.s32.totalorder %v690_v1, 200 }
 0x242   : > { %970 = vst [vmem:[%s1763_s12] sm:$0xff] %v969_v13   ;;  %v712_v18 = vsel %vm696_vm2, %v645_v14, 0.0  ;;  %v589_v19 = vadd.f32 %v1173_v17, %v1743_v53  ;;  %v583_v20 = vpop.f32.mrb[5].mxu1  ;;  %v692_v14 = vadd.s32 %v1738_v52, %v675_v2  ;;  %vm705_vm13 = vcmp.lt.s32.totalorder %v689_v5, 200 }
 0x243   : > { %v711_v21 = vsel %vm695_vm3, %v644_v16, 0.0  ;;  %v584_v22 = vadd.f32 %v1743_v53, %v583_v20  ;;  %v691_v50 = vadd.s32 %v1738_v52, %v674_v6 }
 0x244   : > { %v974_v25 = vpack.c.bf16 %v712_v18, %v711_v21  ;;  %v647_v26 = vmax.f32 %v589_v19, 0.0  ;;  %vm708_vm14 = vcmp.lt.s32.totalorder %v692_v14, 200 }
 0x245   : > { %v646_v29 = vmax.f32 %v584_v22, 0.0  ;;  %v1176_v30 = vpop.f32.mrb[6].mxu1  ;;  %vm707_vm15 = vcmp.lt.s32.totalorder %v691_v50, 200 }
 0x246   : > { %1006 = vst [vmem:[%s1763_s12 + $0x8] sm:$0xff] %v974_v25   ;;  %v714_v31 = vsel %vm698_vm4, %v647_v26, 0.0  ;;  %v599_v32 = vadd.f32 %v1176_v30, %v1743_v53  ;;  %v593_v33 = vpop.f32.mrb[7].mxu1 }
 0x247   : > { %v713_v36 = vsel %vm697_vm5, %v646_v29, 0.0  ;;  %v594_v37 = vadd.f32 %v1743_v53, %v593_v33 }
 0x248   : > { %v979_v39 = vpack.c.bf16 %v714_v31, %v713_v36  ;;  %v649_v40 = vmax.f32 %v599_v32, 0.0 }
 0x249   : > { %v648_v42 = vmax.f32 %v594_v37, 0.0  ;;  %v1179_v43 = vpop.f32.mrb[8].mxu1 }
 0x24a   : > { %1007 = vst [vmem:[%s1763_s12 + $0x10] sm:$0xff] %v979_v39   ;;  %v716_v44 = vsel %vm700_vm6, %v649_v40, 0.0  ;;  %v609_v45 = vadd.f32 %v1179_v43, %v1743_v53  ;;  %v603_v46 = vpop.f32.mrb[9].mxu1 }
 0x24b   : > { %v715_v49 = vsel %vm699_vm7, %v648_v42, 0.0  ;;  %v604_v51 = vadd.f32 %v1743_v53, %v603_v46 }
 0x24c   : > { %v984_v55 = vpack.c.bf16 %v716_v44, %v715_v49  ;;  %v651_v56 = vmax.f32 %v609_v45, 0.0 }
 0x24d   : > { %v650_v58 = vmax.f32 %v604_v51, 0.0  ;;  %v1182_v59 = vpop.f32.mrb[10].mxu1 }
 0x24e   : > { %1008 = vst [vmem:[%s1763_s12 + $0x18] sm:$0xff] %v984_v55   ;;  %v718_v60 = vsel %vm702_vm8, %v651_v56, 0.0  ;;  %v619_v61 = vadd.f32 %v1182_v59, %v1743_v53  ;;  %v613_v62 = vpop.f32.mrb[11].mxu1 }
 0x24f   : > { %v717_v63 = vsel %vm701_vm9, %v650_v58, 0.0  ;;  %v614_v0 = vadd.f32 %v1743_v53, %v613_v62 }
 0x250   : > { %v989_v3 = vpack.c.bf16 %v718_v60, %v717_v63  ;;  %v653_v4 = vmax.f32 %v619_v61, 0.0 }
 0x251   : > { %v652_v7 = vmax.f32 %v614_v0, 0.0  ;;  %v1185_v8 = vpop.f32.mrb[12].mxu1 }
 0x252   : > { %1009 = vst [vmem:[%s1763_s12 + $0x20] sm:$0xff] %v989_v3   ;;  %v720_v9 = vsel %vm704_vm10, %v653_v4, 0.0  ;;  %v629_v10 = vadd.f32 %v1185_v8, %v1743_v53  ;;  %v623_v11 = vpop.f32.mrb[13].mxu1 }
 0x253   : > { %v719_v12 = vsel %vm703_vm11, %v652_v7, 0.0  ;;  %v624_v13 = vadd.f32 %v1743_v53, %v623_v11 }
 0x254   : > { %v994_v15 = vpack.c.bf16 %v720_v9, %v719_v12  ;;  %v655_v16 = vmax.f32 %v629_v10, 0.0 }
 0x255   : > { %v654_v17 = vmax.f32 %v624_v13, 0.0  ;;  %v1188_v18 = vpop.f32.mrb[14].mxu1 }
 0x256   : > { %1010 = vst [vmem:[%s1763_s12 + $0x28] sm:$0xff] %v994_v15   ;;  %v722_v19 = vsel %vm706_vm12, %v655_v16, 0.0  ;;  %v639_v20 = vadd.f32 %v1188_v18, %v1743_v53  ;;  %v633_v21 = vpop.f32.mrb[15].mxu1 }
 0x257   : > { %v721_v22 = vsel %vm705_vm13, %v654_v17, 0.0  ;;  %v634_v23 = vadd.f32 %v1743_v53, %v633_v21 }
 0x258   : > { %v999_v24 = vpack.c.bf16 %v722_v19, %v721_v22  ;;  %v657_v25 = vmax.f32 %v639_v20, 0.0 }
 0x259   : > { %v656_v52 = vmax.f32 %v634_v23, 0.0 }
 0x25a   : > { %1011 = vst [vmem:[%s1763_s12 + $0x30] sm:$0xff] %v999_v24   ;;  %v724_v26 = vsel %vm708_vm14, %v657_v25, 0.0 }
 0x25b   : > { %v723_v27 = vsel %vm707_vm15, %v656_v52, 0.0 }
 0x25c   : > { %v1004_v53 = vpack.c.bf16 %v724_v26, %v723_v27 }
 0x25e   : > { %1012 = vst [vmem:[%s1763_s12 + $0x38] sm:$0xff] %v1004_v53  }
 0x25f   : > { %1423 = shalt.err (!%p1420_p1)
}
 0x260   : > { %s1424_s26 = scalar_lea.hbm %s1808_s7, 1024  ;;  %s1428_s10 = scalar_lea.hbm %s1860_s5, 2048 }
 0x261   : > { %p1425_p13 = scmp.ne.s32.totalorder %s1808_s7, %s1424_s26  ;;  %p1429_p4 = scmp.lt.u32.totalorder %s1808_s7, %s1860_s5 }
 0x262   : > { %p1430_p5 = scmp.lt.u32.totalorder %s1428_s10, %s1424_s26  ;;  %p1432_p11 = scmp.lt.u32.totalorder %s1424_s26, %s1808_s7 }
 0x263   : > { %p1426_p6 = pnand %p1425_p13, %p1874_p0 }
 0x264   : > { %p1431_p8 = por %p1430_p5, %p1429_p4 }
 0x265   : > { %p1427_p10 = pneg %p1426_p6 }
 0x266   : > { %p1433_p2 = por %p1432_p11, %p1431_p8 }
 0x268   : > { %p1434_p3 = pnand %p1433_p2, %p1427_p10 }
 0x26a   : > { %1437 = shalt.err (!%p1434_p3)
}
 0x26b   : > { %s1488_s13 = smov 64   ;;  %s1489_s11 = smov 4  }
 0x26c   : > { %1263 = dma.vmem_to_hbm [thread:$0]  (%p1874_p0), %s1810_s30, 1024, %s1808_s7, %s806_s6, %s1488_s13, %s1488_s13, %s1489_s11  }
 0x26d PF: > { %s834_s17 = sand.u32 1, %s1468_s18   ;;  %p1875_p7 = scmp.ne.s32.totalorder %s1865_s25, 0 }
 0x26e   : > { %p1876_p9 = scmp.ge.s32.totalorder %s1480_s21, 2  ;;  %s835_s8 = scalar_lea.sflag [#allocation4], %s834_s17 }
 0x270   : > { %p1277_p12 = pnand %p1876_p9, %p1875_p7 }
 0x272   : > { %1463 = dma.done.wait (!%p1277_p12), %s835_s8, 1024  }
 0x273   : > { %1465 = vsyncadd (!%p1277_p12), %s835_s8, 4294966272  ;;  %p19_p1 = scmp.ge.s32.totalorder %s1636_s29, 4   ;;  %s1877_s18 = smov %s1472_s19 }
 0x274   : > { %s1878_s19 = smov %s1476_s20  ;;  %s1879_s20 = smov %s1652_s27 }
 0x275   : > { %s1880_s21 = smov %s1636_s29  ;;  %21 = sbr.rel (!%p19_p1) target bundleno = 6 (0x6), region = 93 }
 0x27c   :  { %840 = vsyncpa [#allocation3], 1 }
 0x27d   :  { %842 = vsyncpa [#allocation3 + $0x1], 1 }
 0x27e   :  { %843 = vsyncpa [#allocation6], 1 }
 0x27f   :  { %844 = vsyncpa [#allocation4], 1 }
 0x280   :  { %846 = vsyncpa [#allocation4 + $0x1], 1 }

</bundles_post_ra>
